<compile_context>
chip_gen: v6e
topology: v6e:2x2x1
jax: 0.10.0
libtpu: 0.0.40
codegen_flags: <defaults>
</compile_context>

<pallas_src>
import numpy as np
import jax
import jax.numpy as jnp
from jax import lax
from jax.experimental import pallas as pl
from jax.experimental.pallas import tpu as pltpu

TINY = 1e-13          # tiny_value_of_dtype(float32)
MASK_FILL = -10000.0  # masked_fill value from the reference module
NEG_PAD = -1e30       # padding lanes: exp(NEG_PAD - m) == 0 exactly in f32


def _round_up(x: int, m: int) -> int:
    return (x + m - 1) // m * m


# ----------------------------------------------------------------------------
# Host-side log-uniform candidate sampler (deterministic port of _choice).
# ----------------------------------------------------------------------------
def _choice(num_words: int, num_samples: int, rng: np.random.RandomState):
    num_tries = 0
    num_chosen = 0

    def get_buffer():
        log_samples = rng.rand(num_samples) * np.log(num_words + 1)
        samples = np.exp(log_samples).astype("int64") - 1
        return np.clip(samples, a_min=0, a_max=num_words - 1)

    sample_buffer = get_buffer()
    buffer_index = 0
    samples = set()
    order = []
    while num_chosen < num_samples:
        num_tries += 1
        sample_id = int(sample_buffer[buffer_index])
        if sample_id not in samples:
            samples.add(sample_id)
            order.append(sample_id)
            num_chosen += 1
        buffer_index += 1
        if buffer_index == num_samples:
            sample_buffer = get_buffer()
            buffer_index = 0
    return np.array(order, dtype=np.int64), num_tries


# ----------------------------------------------------------------------------
# Pallas kernel: logits / masked log-softmax / per-row NLL hot path.
# ----------------------------------------------------------------------------
def _sampled_softmax_kernel(emb_ref, true_w_ref, true_bias_ref, targets_ref,
                            w_aug_ref, bias_aug_ref, ids_aug_ref,
                            logits_ref, nll_ref):
    emb = emb_ref[...]                                          # (TB, D) f32

    # true logit per row: sum(true_w * emb, -1) + (true_b - log(tec + tiny))
    true_logits = (jnp.sum(true_w_ref[...] * emb, axis=1, keepdims=True)
                   + true_bias_ref[...])                        # (TB, 1)

    # [0 | sampled | pad] logits in a single lane-dense MXU pass; w_aug is
    # pre-transposed (D, L) so no in-kernel transpose is needed.
    combined = (jnp.dot(emb, w_aug_ref[...],
                        preferred_element_type=jnp.float32)
                + bias_aug_ref[...])                            # (TB, L)

    # mask sampled candidates that collide with the true target
    collide = ids_aug_ref[...] == targets_ref[...]              # (TB, L)
    combined = jnp.where(collide, jnp.float32(MASK_FILL), combined)

    # drop the true logit into lane 0 (ids_aug[0] == -1, so never masked)
    lane = lax.broadcasted_iota(jnp.int32, combined.shape, 1)
    combined = jnp.where(lane == 0, true_logits, combined)

    # row-wise log-softmax denominator; padding lanes carry NEG_PAD bias and
    # contribute exactly zero to the sum.
    m = jnp.max(combined, axis=1, keepdims=True)
    lse = jnp.log(jnp.sum(jnp.exp(combined - m), axis=1, keepdims=True)) + m

    logits_ref[...] = combined                                  # lane-dense store
    nll_ref[...] = lse - true_logits                            # -log_softmax[:,0]


def sampled_softmax_pallas(embeddings, true_w, true_bias, targets_col,
                           w_aug, bias_aug, ids_aug, num_samples,
                           tile_b_max=256):
    B, D = embeddings.shape
    L = w_aug.shape[1]

    tile_b = min(tile_b_max, _round_up(B, 8))
    B_pad = _round_up(B, tile_b)
    if B_pad != B:
        pad = B_pad - B
        embeddings = jnp.pad(embeddings, ((0, pad), (0, 0)))
        true_w = jnp.pad(true_w, ((0, pad), (0, 0)))
        true_bias = jnp.pad(true_bias, ((0, pad), (0, 0)))
        targets_col = jnp.pad(targets_col, ((0, pad), (0, 0)),
                              constant_values=-2)

    grid = (B_pad // tile_b,)
    row_blk = lambda i: (i, 0)
    const_blk = lambda i: (0, 0)   # resident across batch tiles

    logits_full, nll = pl.pallas_call(
        _sampled_softmax_kernel,
        out_shape=(jax.ShapeDtypeStruct((B_pad, L), jnp.float32),
                   jax.ShapeDtypeStruct((B_pad, 1), jnp.float32)),
        grid=grid,
        in_specs=[
            pl.BlockSpec((tile_b, D), row_blk),   # embeddings (streamed)
            pl.BlockSpec((tile_b, D), row_blk),   # true_w     (streamed)
            pl.BlockSpec((tile_b, 1), row_blk),   # true bias  (fused)
            pl.BlockSpec((tile_b, 1), row_blk),   # targets
            pl.BlockSpec((D, L), const_blk),      # sampled weights (resident)
            pl.BlockSpec((1, L), const_blk),      # sampled bias    (resident)
            pl.BlockSpec((1, L), const_blk),      # sampled ids     (resident)
        ],
        out_specs=(pl.BlockSpec((tile_b, L), row_blk),
                   pl.BlockSpec((tile_b, 1), row_blk)),
        compiler_params=pltpu.CompilerParams(
            dimension_semantics=("parallel",)),
    )(embeddings, true_w, true_bias, targets_col, w_aug, bias_aug, ids_aug)

    loss = jnp.sum(nll[:B, 0])
    logits = logits_full[:B, :num_samples + 1]
    return loss, logits


# ----------------------------------------------------------------------------
# Module-equivalent wrapper.
# ----------------------------------------------------------------------------
class SampledSoftmaxLossPallas:
    def __init__(self, num_words, embedding_dim, num_samples, key):
        assert num_samples < num_words
        self._num_words = num_words
        self._embedding_dim = embedding_dim
        self._num_samples = num_samples
        self._log_num_words_p1 = np.log(num_words + 1)
        # deterministic parameter init (mirrors torch.randn(...)/sqrt(dim), zeros)
        self.softmax_w = (jax.random.normal(key, (num_words, embedding_dim),
                                            dtype=jnp.float32)
                          / np.sqrt(embedding_dim))
        self.softmax_b = jnp.zeros((num_words,), dtype=jnp.float32)

    def log_uniform_candidate_sampler(self, targets_np, rng):
        sampled_ids, num_tries = _choice(self._num_words, self._num_samples, rng)
        targets_f = targets_np.astype(np.float64)
        target_probs = (np.log((targets_f + 2.0) / (targets_f + 1.0))
                        / self._log_num_words_p1)
        target_expected_count = -1.0 * (np.exp(num_tries * np.log1p(-target_probs)) - 1.0)
        sampled_f = sampled_ids.astype(np.float64)
        sampled_probs = (np.log((sampled_f + 2.0) / (sampled_f + 1.0))
                         / self._log_num_words_p1)
        sampled_expected_count = -1.0 * (np.exp(num_tries * np.log1p(-sampled_probs)) - 1.0)
        return (sampled_ids,
                target_expected_count.astype(np.float32),
                sampled_expected_count.astype(np.float32))

    def forward_train(self, embeddings, targets_np, rng):
        B = embeddings.shape[0]
        S = self._num_samples
        if B == 0:
            return jnp.float32(0.0), jnp.zeros((0, S + 1), jnp.float32)

        sampled_ids, tec, sec = self.log_uniform_candidate_sampler(targets_np, rng)
        D = self._embedding_dim
        L = _round_up(S + 1, 128)   # lane-dense combined [true | sampled | pad]

        targets = jnp.asarray(targets_np, dtype=jnp.int32)
        sampled = jnp.asarray(sampled_ids, dtype=jnp.int32)

        # embedding gathers (glue)
        true_w = jnp.take(self.softmax_w, targets, axis=0)       # (B, D)
        sampled_w = jnp.take(self.softmax_w, sampled, axis=0)    # (S, D)
        true_b = jnp.take(self.softmax_b, targets, axis=0)       # (B,)
        sampled_b = jnp.take(self.softmax_b, sampled, axis=0)    # (S,)

        # fuse bias and expected-count terms on the host
        true_bias = (true_b - jnp.log(jnp.asarray(tec) + TINY)).reshape(B, 1)
        sampled_bias = sampled_b - jnp.log(jnp.asarray(sec) + TINY)   # (S,)

        # augmented, pre-transposed, lane-dense sampled operands:
        #   lane 0      -> reserved for the true logit (zero weight / bias)
        #   lanes 1..S  -> sampled candidates
        #   lanes S+1.. -> padding (zero weight, NEG_PAD bias, id -1)
        w_aug = jnp.zeros((D, L), jnp.float32).at[:, 1:S + 1].set(sampled_w.T)
        bias_aug = jnp.full((1, L), NEG_PAD, jnp.float32)
        bias_aug = bias_aug.at[0, 0].set(0.0).at[0, 1:S + 1].set(sampled_bias)
        ids_aug = jnp.full((1, L), -1, jnp.int32).at[0, 1:S + 1].set(sampled)

        return sampled_softmax_pallas(
            embeddings, true_w, true_bias, targets.reshape(B, 1),
            w_aug, bias_aug, ids_aug, S)


# ----------------------------------------------------------------------------
# Pure-JAX reference (mirrors the PyTorch _forward_train) for verification.
# ----------------------------------------------------------------------------
def reference_forward(embeddings, softmax_w, softmax_b, targets, sampled_ids,
                      tec, sec):
    true_w = softmax_w[targets]
    sampled_w = softmax_w[sampled_ids]
    true_b = softmax_b[targets]
    sampled_b = softmax_b[sampled_ids]
    true_logits = (true_w * embeddings).sum(axis=1) + true_b - jnp.log(tec + TINY)
    sampled_logits = embeddings @ sampled_w.T + sampled_b - jnp.log(sec + TINY)
    mask = sampled_ids[None, :] == targets[:, None]
    masked = jnp.where(mask, MASK_FILL, sampled_logits)
    logits = jnp.concatenate([true_logits[:, None], masked], axis=1)
    log_softmax = jax.nn.log_softmax(logits, axis=1)
    return -jnp.sum(log_softmax[:, 0]), logits


if __name__ == "__main__":
    num_words = 512
    embedding_dim = 128
    num_samples = 64
    batch = 8

    key = jax.random.PRNGKey(0)
    k_w, k_emb, k_tgt = jax.random.split(key, 3)

    module = SampledSoftmaxLossPallas(num_words, embedding_dim, num_samples, k_w)

    embeddings = jax.random.normal(k_emb, (batch, embedding_dim), dtype=jnp.float32)
    targets_np = np.asarray(
        jax.random.randint(k_tgt, (batch,), 0, num_words, dtype=jnp.int32))

    rng = np.random.RandomState(0)  # deterministic host-side sampler
    loss, logits = module.forward_train(embeddings, targets_np, rng)
    loss = jax.block_until_ready(loss)
    logits = jax.block_until_ready(logits)

    # verify against pure-JAX reference (re-run sampler with same seed)
    rng_ref = np.random.RandomState(0)
    sampled_ids, tec, sec = module.log_uniform_candidate_sampler(targets_np, rng_ref)
    ref_loss, ref_logits = reference_forward(
        embeddings, module.softmax_w, module.softmax_b,
        jnp.asarray(targets_np, jnp.int32), jnp.asarray(sampled_ids, jnp.int32),
        jnp.asarray(tec), jnp.asarray(sec))

    assert logits.shape == (batch, num_samples + 1), "logits shape mismatch"
    assert np.allclose(np.asarray(logits), np.asarray(ref_logits),
                       rtol=1e-4, atol=1e-4), "logits mismatch"
    assert np.allclose(float(loss), float(ref_loss),
                       rtol=1e-4, atol=1e-4), "loss mismatch"

    print("KERNEL_OK")
</pallas_src>

<mosaic_0001>
module attributes {stable_mosaic.version = 11 : i64} {
  func.func @_sampled_softmax_kernel(%arg0: i32, %arg1: memref<8x128xf32, #tpu.memory_space<vmem>>, %arg2: memref<8x128xf32, #tpu.memory_space<vmem>>, %arg3: memref<8x1xf32, #tpu.memory_space<vmem>>, %arg4: memref<8x1xi32, #tpu.memory_space<vmem>>, %arg5: memref<128x128xf32, #tpu.memory_space<vmem>>, %arg6: memref<1x128xf32, #tpu.memory_space<vmem>>, %arg7: memref<1x128xi32, #tpu.memory_space<vmem>>, %arg8: memref<8x128xf32, #tpu.memory_space<vmem>>, %arg9: memref<8x1xf32, #tpu.memory_space<vmem>>) attributes {dimension_semantics = [#tpu.dimension_semantics<parallel>], iteration_bounds = array<i64: 1>, scalar_prefetch = 0 : i64, scratch_operands = 0 : i64, tpu.core_type = #tpu.core_type<tc>, window_params = [{transform_indices = @transform_0, window_bounds = array<i64: 8, 128>}, {transform_indices = @transform_1, window_bounds = array<i64: 8, 128>}, {transform_indices = @transform_2, window_bounds = array<i64: 8, 1>}, {transform_indices = @transform_3, window_bounds = array<i64: 8, 1>}, {pipeline_mode = #tpu.pipeline_mode<synchronous>, transform_indices = @transform_4, window_bounds = array<i64: 128, 128>}, {pipeline_mode = #tpu.pipeline_mode<synchronous>, transform_indices = @transform_5, window_bounds = array<i64: 1, 128>}, {pipeline_mode = #tpu.pipeline_mode<synchronous>, transform_indices = @transform_6, window_bounds = array<i64: 1, 128>}, {transform_indices = @transform_7, window_bounds = array<i64: 8, 128>}, {transform_indices = @transform_8, window_bounds = array<i64: 8, 1>}]} {
    %c0 = arith.constant 0 : index
    %c0_0 = arith.constant 0 : index
    %0 = vector.load %arg1[%c0, %c0_0] : memref<8x128xf32, #tpu.memory_space<vmem>>, vector<8x128xf32>
    %c0_1 = arith.constant 0 : index
    %c0_2 = arith.constant 0 : index
    %1 = vector.load %arg2[%c0_1, %c0_2] : memref<8x128xf32, #tpu.memory_space<vmem>>, vector<8x128xf32>
    %2 = arith.mulf %1, %0 : vector<8x128xf32>
    %cst = arith.constant dense<0.000000e+00> : vector<8xf32>
    %3 = vector.multi_reduction <add>, %2, %cst [1] : vector<8x128xf32> to vector<8xf32>
    %4 = vector.shape_cast %3 : vector<8xf32> to vector<8x1xf32>
    %c0_3 = arith.constant 0 : index
    %c0_4 = arith.constant 0 : index
    %5 = vector.load %arg3[%c0_3, %c0_4] : memref<8x1xf32, #tpu.memory_space<vmem>>, vector<8x1xf32>
    %6 = arith.addf %4, %5 : vector<8x1xf32>
    %c0_5 = arith.constant 0 : index
    %c0_6 = arith.constant 0 : index
    %7 = vector.load %arg5[%c0_5, %c0_6] : memref<128x128xf32, #tpu.memory_space<vmem>>, vector<128x128xf32>
    %cst_7 = arith.constant dense<0.000000e+00> : vector<8x128xf32>
    %8 = tpu.matmul %0, %7, %cst_7 {dimension_numbers = #tpu.dot_dimension_numbers<[1], [0], [0], [1], [0, 0, 1, 1], [], []>} : vector<8x128xf32>, vector<128x128xf32>, vector<8x128xf32> -> vector<8x128xf32>
    %c0_8 = arith.constant 0 : index
    %c0_9 = arith.constant 0 : index
    %9 = vector.load %arg6[%c0_8, %c0_9] : memref<1x128xf32, #tpu.memory_space<vmem>>, vector<1x128xf32>
    %10 = vector.broadcast %9 : vector<1x128xf32> to vector<8x128xf32>
    %11 = arith.addf %8, %10 : vector<8x128xf32>
    %c0_10 = arith.constant 0 : index
    %c0_11 = arith.constant 0 : index
    %12 = vector.load %arg7[%c0_10, %c0_11] : memref<1x128xi32, #tpu.memory_space<vmem>>, vector<1x128xi32>
    %c0_12 = arith.constant 0 : index
    %c0_13 = arith.constant 0 : index
    %13 = vector.load %arg4[%c0_12, %c0_13] : memref<8x1xi32, #tpu.memory_space<vmem>>, vector<8x1xi32>
    %14 = vector.broadcast %12 : vector<1x128xi32> to vector<8x128xi32>
    %15 = vector.broadcast %13 : vector<8x1xi32> to vector<8x128xi32>
    %16 = arith.cmpi eq, %14, %15 : vector<8x128xi32>
    %cst_14 = arith.constant -1.000000e+04 : f32
    %17 = vector.broadcast %cst_14 : f32 to vector<8x128xf32>
    %18 = arith.select %16, %17, %11 : vector<8x128xi1>, vector<8x128xf32>
    %19 = tpu.iota {dimensions = array<i32: 1>} : vector<8x128xi32>
    %c0_i32 = arith.constant 0 : i32
    %20 = vector.broadcast %c0_i32 : i32 to vector<8x128xi32>
    %21 = arith.cmpi eq, %19, %20 : vector<8x128xi32>
    %22 = vector.shape_cast %6 : vector<8x1xf32> to vector<8x1xf32>
    %23 = vector.broadcast %22 : vector<8x1xf32> to vector<8x128xf32>
    %24 = arith.select %21, %23, %18 : vector<8x128xi1>, vector<8x128xf32>
    %cst_15 = arith.constant dense<0xFF800000> : vector<8xf32>
    %25 = vector.multi_reduction <maximumf>, %24, %cst_15 [1] : vector<8x128xf32> to vector<8xf32>
    %26 = vector.shape_cast %25 : vector<8xf32> to vector<8x1xf32>
    %27 = vector.broadcast %26 : vector<8x1xf32> to vector<8x128xf32>
    %28 = arith.subf %24, %27 : vector<8x128xf32>
    %29 = math.exp %28 : vector<8x128xf32>
    %cst_16 = arith.constant dense<0.000000e+00> : vector<8xf32>
    %30 = vector.multi_reduction <add>, %29, %cst_16 [1] : vector<8x128xf32> to vector<8xf32>
    %31 = vector.shape_cast %30 : vector<8xf32> to vector<8x1xf32>
    %32 = math.log %31 : vector<8x1xf32>
    %33 = arith.addf %32, %26 : vector<8x1xf32>
    %c0_17 = arith.constant 0 : index
    %c0_18 = arith.constant 0 : index
    %34 = vector.load %arg8[%c0_17, %c0_18] : memref<8x128xf32, #tpu.memory_space<vmem>>, vector<8x128xf32>
    tpu.vector_store %arg8[%c0_17, %c0_18], %24 {strides = array<i32>} : memref<8x128xf32, #tpu.memory_space<vmem>>, vector<8x128xf32>,
    %35 = arith.subf %33, %6 : vector<8x1xf32>
    %c0_19 = arith.constant 0 : index
    %c0_20 = arith.constant 0 : index
    %36 = vector.load %arg9[%c0_19, %c0_20] : memref<8x1xf32, #tpu.memory_space<vmem>>, vector<8x1xf32>
    tpu.vector_store %arg9[%c0_19, %c0_20], %35 {strides = array<i32>} : memref<8x1xf32, #tpu.memory_space<vmem>>, vector<8x1xf32>,
    return
  }
  func.func @transform_0(%arg0: i32) -> (i32, i32) {
    %c0_i32 = arith.constant 0 : i32
    %c0_i32_0 = arith.constant 0 : i32
    return %arg0, %c0_i32 : i32, i32
  }
  func.func @transform_1(%arg0: i32) -> (i32, i32) {
    %c0_i32 = arith.constant 0 : i32
    %c0_i32_0 = arith.constant 0 : i32
    return %arg0, %c0_i32 : i32, i32
  }
  func.func @transform_2(%arg0: i32) -> (i32, i32) {
    %c0_i32 = arith.constant 0 : i32
    %c0_i32_0 = arith.constant 0 : i32
    return %arg0, %c0_i32 : i32, i32
  }
  func.func @transform_3(%arg0: i32) -> (i32, i32) {
    %c0_i32 = arith.constant 0 : i32
    %c0_i32_0 = arith.constant 0 : i32
    return %arg0, %c0_i32 : i32, i32
  }
  func.func @transform_4(%arg0: i32) -> (i32, i32) {
    %c0_i32 = arith.constant 0 : i32
    %c0_i32_0 = arith.constant 0 : i32
    %c0_i32_1 = arith.constant 0 : i32
    return %c0_i32, %c0_i32_0 : i32, i32
  }
  func.func @transform_5(%arg0: i32) -> (i32, i32) {
    %c0_i32 = arith.constant 0 : i32
    %c0_i32_0 = arith.constant 0 : i32
    %c0_i32_1 = arith.constant 0 : i32
    return %c0_i32, %c0_i32_0 : i32, i32
  }
  func.func @transform_6(%arg0: i32) -> (i32, i32) {
    %c0_i32 = arith.constant 0 : i32
    %c0_i32_0 = arith.constant 0 : i32
    %c0_i32_1 = arith.constant 0 : i32
    return %c0_i32, %c0_i32_0 : i32, i32
  }
  func.func @transform_7(%arg0: i32) -> (i32, i32) {
    %c0_i32 = arith.constant 0 : i32
    %c0_i32_0 = arith.constant 0 : i32
    return %arg0, %c0_i32 : i32, i32
  }
  func.func @transform_8(%arg0: i32) -> (i32, i32) {
    %c0_i32 = arith.constant 0 : i32
    %c0_i32_0 = arith.constant 0 : i32
    return %arg0, %c0_i32 : i32, i32
  }
}

</mosaic_0001>

<bundles_post_ra>
// kernel: tpu_custom_call.1
= control target key start
LH: loop header
LB: loop body
LE: loop exit
PB: predicated region body
PF: predicated region fallthrough
CT: control target
= control target key end

     0   :  { %14 = vsyncpa [#allocation3], 0  ;;  %s386_s0 = inlined_call_operand.vmem [shape: f32[8,128], index: 0, kind: input, shape index: {}]   ;;  %s387_s1 = inlined_call_operand.vmem [shape: f32[8,128], index: 1, kind: input, shape index: {}]   ;;  %s388_s2 = inlined_call_operand.vmem [shape: f32[8,1], index: 2, kind: input, shape index: {}]   ;;  %s389_s3 = inlined_call_operand.vmem [shape: s32[8,1], index: 3, kind: input, shape index: {}]   ;;  %s390_s4 = inlined_call_operand.hbm [shape: f32[128,128], index: 4, kind: input, shape index: {}]   ;;  %s391_s5 = inlined_call_operand.vmem [shape: f32[1,128], index: 5, kind: input, shape index: {}]   ;;  %s392_s6 = inlined_call_operand.vmem [shape: s32[1,128], index: 6, kind: input, shape index: {}]   ;;  %s393_s7 = inlined_call_operand.hbm [shape: f32[8,128], index: 7, kind: output, shape index: {0}]   ;;  %s394_s8 = inlined_call_operand.vmem [shape: f32[8,1], index: 8, kind: output, shape index: {1}]  }
   0x1   :  { %15 = vsyncpa [#allocation4], 0  ;;  %s307_s27 = smov [#allocation2]  }
   0x2   :  { %s29_s28 = sshll.u32 %s307_s27, 4  ;;  %s30_s28 = int_to_ptr.vmem [resolvable:$true] %s29_s28 }
   0x3   :  { %s271_s29 = scalar_lea.vmem %s30_s28, 2048  ;;  %p276_p1 = scmp.lt.s32.totalorder %s30_s28, %s30_s28 }
   0x4   :  { %p272_p0 = scmp.ne.s32.totalorder %s30_s28, %s271_s29  ;;  %p277_p2 = scmp.lt.s32.totalorder %s271_s29, %s271_s29 }
   0x6   :  { %p278_p3 = por %p277_p2, %p276_p1 }
   0x8   :  { %p279_p4 = pnand %p278_p3, %p272_p0 }
   0xa   :  { %282 = shalt.err (!%p279_p4)
}
   0xb   :  { %s308_s30 = smov 128   ;;  %s309_s9 = smov 8  }
   0xc   :  { %35 = dma.hbm_to_vmem [thread:$0]  %s390_s4, 2048, %s30_s28, [#allocation3], %s308_s30, %s308_s30, %s309_s9  }
   0xd   :  { %303 = dma.done.wait [#allocation3], 2048  }
   0xe   :  { %304 = vsyncadd [#allocation3], 4294965248  ;;  %v310_v0 = vmov 0.0   ;;  %vm311_vm0 = vmmov 0   ;;  %v312_v1 = vmov 0   ;;  %v43_v2 = vld [vmem:[%s386_s0] sm:$0xff]  ;;  %v154_v27 = vlaneseq }
   0xf   :  { %215 = vmatprep.subr.mxu0 %v310_v0  ;;  %247 = vmatprep.mubr.msk.f32.mxu0 %vm311_vm0, %v310_v0  ;;  %v44_v3 = vld [vmem:[%s387_s1] sm:$0xff]  ;;  %v65_v4 = vld [vmem:[#allocation2 + $0x78] sm:$0xff]  ;;  %v64_v6 = vld [vmem:[#allocation2 + $0x70] sm:$0xff] }
  0x10   :  { %257 = vset.pattern.permute.xlu0 %v312_v1  ;;  %258 = vset.pattern.permute.xlu1 %v312_v1  ;;  %v45_v5 = vmul.f32 %v44_v3, %v43_v2  ;;  %v63_v7 = vld [vmem:[#allocation2 + $0x68] sm:$0xff]  ;;  %v62_v8 = vld [vmem:[#allocation2 + $0x60] sm:$0xff]  ;;  %v61_v9 = vld [vmem:[#allocation2 + $0x58] sm:$0xff]  ;;  %v155_v32 = vand.u32 127, %v154_v27 }
  0x11   :  { %216 = vmatpush3.msra.mxu0 %v65_v4  ;;  %v60_v10 = vld [vmem:[#allocation2 + $0x50] sm:$0xff]  ;;  %v59_v11 = vld [vmem:[#allocation2 + $0x48] sm:$0xff]  ;;  %v58_v12 = vld [vmem:[#allocation2 + $0x40] sm:$0xff] }
  0x12   :  { %217 = vmatprep.subr.mxu0 %v310_v0  ;;  %46 = vadd.xlane.f32.xlu0 %v45_v5  ;;  %v57_v13 = vld [vmem:[#allocation2 + $0x38] sm:$0xff]  ;;  %v56_v14 = vld [vmem:[#allocation2 + $0x30] sm:$0xff]  ;;  %v55_v15 = vld [vmem:[#allocation2 + $0x28] sm:$0xff]  ;;  %vm156_vm2 = vcmp.eq.s32.totalorder %v155_v32, 0 }
  0x13   :  { %218 = vmatpush3.msra.mxu0 %v64_v6  ;;  %v54_v16 = vld [vmem:[#allocation2 + $0x20] sm:$0xff]  ;;  %v53_v17 = vld [vmem:[#allocation2 + $0x18] sm:$0xff]  ;;  %v52_v19 = vld [vmem:[#allocation2 + $0x10] sm:$0xff] }
  0x14   :  { %219 = vmatprep.subr.mxu0 %v310_v0  ;;  %v144_v18 = vld [vmem:[%s389_s3] sm:$0xff]  ;;  %v51_v20 = vld [vmem:[#allocation2 + $0x8] sm:$0xff] }
  0x15   :  { %220 = vmatpush3.msra.mxu0 %v63_v7  ;;  %v50_v21 = vld [vmem:[#allocation2] sm:$0xff] }
  0x16   :  { %221 = vmatprep.subr.mxu0 %v310_v0  ;;  %v48_v22 = vld [vmem:[%s388_s2] sm:$0xff]  ;;  %s313_s2 = smov [#allocation5]  }
  0x17   :  { %222 = vmatpush3.msra.mxu0 %v62_v8  ;;  %v196_v28 = vld [vmem:[%s391_s5] ss:$0 sm:$0xff]  ;;  %s183_s5 = sshll.u32 %s313_s2, 4  ;;  %s184_s5 = int_to_ptr.vmem [resolvable:$true] %s183_s5 }
  0x18   :  { %223 = vmatprep.subr.mxu0 %v310_v0  ;;  %v197_v29 = vld [vmem:[%s392_s6] ss:$0 sm:$0xff]  ;;  %s283_s6 = scalar_lea.vmem %s184_s5, 128  ;;  %p288_p6 = scmp.lt.s32.totalorder %s184_s5, %s184_s5 }
  0x19   :  { %224 = vmatpush3.msra.mxu0 %v61_v9  ;;  %p284_p5 = scmp.ne.s32.totalorder %s184_s5, %s283_s6  ;;  %p289_p7 = scmp.lt.s32.totalorder %s283_s6, %s283_s6 }
  0x1a   :  { %225 = vmatprep.subr.mxu0 %v310_v0 }
  0x1b   :  { %226 = vmatpush3.msra.mxu0 %v60_v10  ;;  %p290_p8 = por %p289_p7, %p288_p6 }
  0x1c   :  { %227 = vmatprep.subr.mxu0 %v310_v0 }
  0x1d   :  { %228 = vmatpush3.msra.mxu0 %v59_v11  ;;  %p291_p9 = pnand %p290_p8, %p284_p5 }
  0x1e   :  { %229 = vmatprep.subr.mxu0 %v310_v0 }
  0x1f   :  { %230 = vmatpush3.msra.mxu0 %v58_v12 }
  0x20   :  { %231 = vmatprep.subr.mxu0 %v310_v0 }
  0x21   :  { %232 = vmatpush3.msra.mxu0 %v57_v13 }
  0x22   :  { %233 = vmatprep.subr.mxu0 %v310_v0 }
  0x23   :  { %234 = vmatpush3.msra.mxu0 %v56_v14 }
  0x24   :  { %235 = vmatprep.subr.mxu0 %v310_v0 }
  0x25   :  { %236 = vmatpush3.msra.mxu0 %v55_v15 }
  0x26   :  { %237 = vmatprep.subr.mxu0 %v310_v0 }
  0x27   :  { %238 = vmatpush3.msra.mxu0 %v54_v16 }
  0x28   :  { %239 = vmatprep.subr.mxu0 %v310_v0  ;;  %150 = vperm.xlu0 %257, %v144_v18  }
  0x29   :  { %240 = vmatpush3.msra.mxu0 %v53_v17 }
  0x2a   :  { %241 = vmatprep.subr.mxu0 %v310_v0 }
  0x2b   :  { %242 = vmatpush3.msra.mxu0 %v52_v19 }
  0x2c   :  { %243 = vmatprep.subr.mxu0 %v310_v0 }
  0x2d   :  { %244 = vmatpush3.msra.mxu0 %v51_v20 }
  0x2e   :  { %245 = vmatprep.subr.mxu0 %v310_v0 }
  0x2f   :  { %246 = vmatpush3.msra.mxu0 %v50_v21 }
  0x30   :  { %248 = vmatmul.mubr.f32.vlgmr.msra.gmra.mxu0 %v43_v2 }
  0x9b   :  { %v47_v23 = vpop.xlane.xlu0 %46 }
  0x9c   :  { %v49_v24 = vadd.f32 %v48_v22, %v47_v23 }
  0x9e   :  { %159 = vperm.xlu1 %258, %v49_v24  }
  0xa3   :  { %v151_v30 = vpop.permute.xlu0 %150 }
  0xa4   :  { %vm152_vm1 = vcmp.eq.s32.totalorder %v197_v29, %v151_v30 }
  0xf0   :  { %v139_v25 = vpop.f32.mrf.mxu0 }
  0xf1   :  { %v140_v31 = vadd.f32 %v196_v28, %v139_v25 }
  0xf2   :  { %v249_v26 = vpop.f32.mrf.mxu0 }
  0xf3   :  { %v153_v33 = vsel %vm152_vm1, -10000.0, %v140_v31 }
 0x119   :  { %v160_v34 = vpop.permute.xlu1 %159 }
 0x11a   :  { %v162_v35 = vsel %vm156_vm2, %v160_v34, %v153_v33 }
 0x11b   :  { %163 = vmax.xlane.f32.xlu1 %v162_v35  ;;  %173 = vst [vmem:[#allocation5] sm:$0xff] %v162_v35 }
 0x1a4   :  { %v164_v36 = vpop.xlane.xlu1 %163 }
 0x1a5   :  { %v165_v37 = vsub.f32 %v162_v35, %v164_v36 }
 0x1a7   :  { %v166_v38 = vmul.f32 1.442695, %v165_v37 }
 0x1a9   :  { %259 = vpow2.f32 %v166_v38 }
 0x1b6   :  { %v260_v39 = vpop.eup %259 }
 0x1b7   :  { %168 = vadd.xlane.f32.xlu1 %v260_v39 }
 0x1b8   :  { %294 = shalt.err (!%p291_p9)
}
 0x1b9   :  { %186 = dma.vmem_to_hbm [thread:$0]  %s184_s5, 128, %s393_s7, [#allocation4]   ;;  %vm175_vm3 = vcmask 7168  }
 0x240   :  { %v169_v40 = vpop.xlane.xlu1 %168 }
 0x241   :  { %261 = vlog2.f32 %v169_v40 }
 0x24e   :  { %v262_v41 = vpop.eup %261 }
 0x24f   :  { %v171_v42 = vmul.f32 0.6931472, %v262_v41 }
 0x251   :  { %v172_v43 = vadd.f32 %v171_v42, %v164_v36 }
 0x253   :  { %v174_v44 = vsub.f32 %v172_v43, %v49_v24 }
 0x255   :  { %176 = vst.msk [vmem:[%s394_s8] sm:$0xff] %vm175_vm3, %v174_v44 }
 0x256   :  { %305 = dma.done.wait [#allocation4], 128  }
 0x257   :  { %306 = vsyncadd [#allocation4], 4294967168 }
 0x258   :  { %194 = vsyncpa [#allocation3], 1 }
 0x259   :  { %195 = vsyncpa [#allocation4], 1 }

</bundles_post_ra>
